<compile_context>
chip_gen: v5e
topology: v5e:2x2
jax: 0.10.0
libtpu: 0.0.40
codegen_flags: <defaults>
</compile_context>

<pallas_src>
import jax
import jax.numpy as jnp
from jax.experimental import pallas as pl
from jax.experimental.pallas import tpu as pltpu

# ----------------------------- configuration -------------------------------
B, CIN, H, W = 2, 3, 16, 16      # small image batch, NCHW at the API boundary
K = 3                            # conv kernel size
COUT = 32                        # stem width of the synthetic backbone

HW = H * W                       # 256 spatial positions
KKC = K * K * CIN                # 27  raw contraction dim
KKC_PAD = 32                     # tile-aligned contraction dim (27 data + 1 bias + 4 zero)
TILE_HW = 128                    # spatial tile per grid step (multiple of 8)
N_HW = HW // TILE_HW             # HW-reduction grid extent


# ------------------------------- kernel ------------------------------------
def ld_baseline_kernel(patches_ref, wc_ref, wh_ref, bh_ref, out_ref, acc_ref):
    """Fused conv-stem + ReLU + global pool + head + sigmoid.

    grid = (B, N_HW); axis 0 "parallel" (batch), axis 1 "arbitrary" (HW reduction).

    patches_ref : [TILE_HW, KKC_PAD]  im2col'd tile (bias ones-column folded in)
    wc_ref      : [KKC_PAD, COUT]     conv weight (bias row folded in)
    wh_ref      : [COUT, 1]           classifier weight, pre-scaled by 1/HW
    bh_ref      : [1, 1]  (SMEM)      classifier bias
    out_ref     : [1, 1]              sigmoid(logit) for this batch element
    acc_ref     : [1, COUT]  (VMEM)   running sum-pool accumulator
    """
    hw = pl.program_id(1)

    @pl.when(hw == 0)
    def _():
        acc_ref[...] = jnp.zeros_like(acc_ref)

    # Conv stem as a single 2-D MXU matmul (bias handled by the folded ones-column).
    feat = jnp.dot(patches_ref[...], wc_ref[...],
                   preferred_element_type=jnp.float32)          # [TILE_HW, COUT]
    feat = jnp.maximum(feat, 0.0)                               # ReLU (VPU)

    # Partial global-sum pool over this spatial tile (XLU sublane reduction).
    acc_ref[...] += jnp.sum(feat, axis=0, keepdims=True)        # [1, COUT]

    @pl.when(hw == pl.num_programs(1) - 1)
    def _():
        # Head: 1/HW is already folded into wh, so sum-pool == mean-pool here.
        logit = jnp.dot(acc_ref[...], wh_ref[...],
                        preferred_element_type=jnp.float32) + bh_ref[0, 0]   # [1, 1]
        out_ref[...] = jax.nn.sigmoid(logit).astype(out_ref.dtype)


# ------------------------------- wrapper ------------------------------------
def _im2col_nhwc(x_nhwc):
    """[B,H,W,C] -> [B, H*W, K*K*C], 3x3 window, stride 1, SAME padding.

    Row ordering inside the last dim is (ki, kj, c), matching an HWIO conv
    weight reshaped to [K*K*C, COUT].
    """
    b, h, w, c = x_nhwc.shape
    xp = jnp.pad(x_nhwc, ((0, 0), (1, 1), (1, 1), (0, 0)))
    cols = [xp[:, i:i + h, j:j + w, :] for i in range(K) for j in range(K)]
    patches = jnp.concatenate(cols, axis=-1)                     # [B,H,W,K*K*C]
    return patches.reshape(b, h * w, K * K * c)


@jax.jit
def ld_baseline_forward(x_nchw, wc, bc, wh, bh):
    """sigmoid(backbone(x)) for NCHW input; returns [B, 1] float32."""
    b = x_nchw.shape[0]
    x_nhwc = jnp.transpose(x_nchw, (0, 2, 3, 1)).astype(jnp.float32)
    patches = _im2col_nhwc(x_nhwc)                               # [B, HW, 27]

    # Pad contraction dim 27 -> 32.  Column 27 is a constant 1 so the conv bias can be
    # folded into row 27 of the weight; remaining columns/rows are zero (exact).
    ones_col = jnp.ones((b, HW, 1), jnp.float32)
    zero_cols = jnp.zeros((b, HW, KKC_PAD - KKC - 1), jnp.float32)
    patches_p = jnp.concatenate([patches, ones_col, zero_cols], axis=-1)   # [B, HW, 32]

    wc_p = jnp.concatenate(
        [wc.astype(jnp.float32),
         bc.reshape(1, COUT).astype(jnp.float32),
         jnp.zeros((KKC_PAD - KKC - 1, COUT), jnp.float32)],
        axis=0)                                                  # [32, COUT]

    wh_s = (wh / float(HW)).astype(jnp.float32)                  # fold mean-pool scale
    bh_s = bh.reshape(1, 1).astype(jnp.float32)                  # SMEM scalar

    out3 = pl.pallas_call(
        ld_baseline_kernel,
        out_shape=jax.ShapeDtypeStruct((b, 1, 1), jnp.float32),
        grid_spec=pltpu.PrefetchScalarGridSpec(
            num_scalar_prefetch=0,
            grid=(b, N_HW),
            in_specs=[
                pl.BlockSpec((None, TILE_HW, KKC_PAD), lambda bi, hi: (bi, hi, 0)),
                pl.BlockSpec((KKC_PAD, COUT), lambda bi, hi: (0, 0)),
                pl.BlockSpec((COUT, 1), lambda bi, hi: (0, 0)),
                pl.BlockSpec(memory_space=pltpu.MemorySpace.SMEM),
            ],
            out_specs=pl.BlockSpec((None, 1, 1), lambda bi, hi: (bi, 0, 0)),
            scratch_shapes=[pltpu.VMEM((1, COUT), jnp.float32)],
        ),
        compiler_params=pltpu.CompilerParams(
            dimension_semantics=("parallel", "arbitrary")),
    )(patches_p, wc_p, wh_s, bh_s)

    return out3.reshape(b, 1)


# ------------------------------ reference -----------------------------------
def ld_baseline_reference(x_nchw, wc, bc, wh, bh):
    """Plain-JAX reference (lax conv) for correctness checking."""
    x_nhwc = jnp.transpose(x_nchw, (0, 2, 3, 1)).astype(jnp.float32)
    w_hwio = wc.reshape(K, K, CIN, COUT)
    y = jax.lax.conv_general_dilated(
        x_nhwc, w_hwio, window_strides=(1, 1), padding="SAME",
        dimension_numbers=("NHWC", "HWIO", "NHWC"),
    )
    y = jax.nn.relu(y + bc.reshape(1, 1, 1, COUT))
    pooled = jnp.mean(y, axis=(1, 2))                            # global avg pool
    logit = pooled @ wh + bh                                     # [B, 1]
    return jax.nn.sigmoid(logit)


# --------------------------------- main --------------------------------------
if __name__ == "__main__":
    key = jax.random.PRNGKey(0)
    kx, kwc, kbc, kwh, kbh = jax.random.split(key, 5)

    # Deterministic synthetic parameters (no checkpoint loading).
    # TODO(synk): real timm pretrained backbone weights are out of scope; the synthetic
    # conv->ReLU->GAP->Linear stem stands in for `timm.create_model(..., num_classes=1)`.
    x = jax.random.normal(kx, (B, CIN, H, W), dtype=jnp.float32)
    wc = 0.1 * jax.random.normal(kwc, (KKC, COUT), dtype=jnp.float32)
    bc = 0.1 * jax.random.normal(kbc, (1, COUT), dtype=jnp.float32)
    wh = 0.1 * jax.random.normal(kwh, (COUT, 1), dtype=jnp.float32)
    bh = 0.1 * jax.random.normal(kbh, (1, 1), dtype=jnp.float32)

    out = jax.block_until_ready(ld_baseline_forward(x, wc, bc, wh, bh))
    ref = jax.block_until_ready(ld_baseline_reference(x, wc, bc, wh, bh))

    assert out.shape == (B, 1), out.shape
    assert jnp.all((out >= 0.0) & (out <= 1.0))
    assert jnp.allclose(out, ref, atol=1e-5, rtol=1e-5), (out, ref)

    print("KERNEL_OK")
</pallas_src>

<mosaic_0001>
module attributes {stable_mosaic.version = 11 : i64} {
  func.func @ld_baseline_kernel(%arg0: i32, %arg1: i32, %arg2: memref<1x128x32xf32, #tpu.memory_space<vmem>>, %arg3: memref<32x32xf32, #tpu.memory_space<vmem>>, %arg4: memref<32x1xf32, #tpu.memory_space<vmem>>, %arg5: memref<1x1xf32, #tpu.memory_space<smem>>, %arg6: memref<1x1x1xf32, #tpu.memory_space<vmem>>, %arg7: memref<1x32xf32, #tpu.memory_space<vmem>>) attributes {dimension_semantics = [#tpu.dimension_semantics<parallel>, #tpu.dimension_semantics<arbitrary>], iteration_bounds = array<i64: 2, 2>, scalar_prefetch = 0 : i64, scratch_operands = 1 : i64, tpu.core_type = #tpu.core_type<tc>, window_params = [{transform_indices = @transform_0, window_bounds = array<i64: 1, 128, 32>}, {pipeline_mode = #tpu.pipeline_mode<synchronous>, transform_indices = @transform_1, window_bounds = array<i64: 32, 32>}, {pipeline_mode = #tpu.pipeline_mode<synchronous>, transform_indices = @transform_2, window_bounds = array<i64: 32, 1>}, {transform_indices = @transform_3, window_bounds = array<i64: 1, 1>}, {transform_indices = @transform_4, window_bounds = array<i64: 1, 1, 1>}]} {
    %c0_i32 = arith.constant 0 : i32
    %0 = arith.cmpi eq, %arg1, %c0_i32 : i32
    %1 = arith.extui %0 : i1 to i32
    %c0_i32_0 = arith.constant 0 : i32
    %2 = arith.cmpi ne, %1, %c0_i32_0 : i32
    scf.if %2 {
      %cst_12 = arith.constant 0.000000e+00 : f32
      %17 = vector.broadcast %cst_12 : f32 to vector<1x32xf32>
      %c0_13 = arith.constant 0 : index
      %c0_14 = arith.constant 0 : index
      %18 = vector.load %arg7[%c0_13, %c0_14] : memref<1x32xf32, #tpu.memory_space<vmem>>, vector<1x32xf32>
      tpu.vector_store %arg7[%c0_13, %c0_14], %17 {strides = array<i32>} : memref<1x32xf32, #tpu.memory_space<vmem>>, vector<1x32xf32>,
    } else {
    }
    %c0 = arith.constant 0 : index
    %c0_1 = arith.constant 0 : index
    %c0_2 = arith.constant 0 : index
    %3 = vector.load %arg2[%c0, %c0_1, %c0_2] : memref<1x128x32xf32, #tpu.memory_space<vmem>>, vector<1x128x32xf32>
    %4 = vector.shape_cast %3 : vector<1x128x32xf32> to vector<128x32xf32>
    %c0_3 = arith.constant 0 : index
    %c0_4 = arith.constant 0 : index
    %5 = vector.load %arg3[%c0_3, %c0_4] : memref<32x32xf32, #tpu.memory_space<vmem>>, vector<32x32xf32>
    %cst = arith.constant dense<0.000000e+00> : vector<128x32xf32>
    %6 = tpu.matmul %4, %5, %cst {dimension_numbers = #tpu.dot_dimension_numbers<[1], [0], [0], [1], [0, 0, 1, 1], [], []>} : vector<128x32xf32>, vector<32x32xf32>, vector<128x32xf32> -> vector<128x32xf32>
    %cst_5 = arith.constant 0.000000e+00 : f32
    %7 = vector.broadcast %cst_5 : f32 to vector<128x32xf32>
    %8 = arith.maximumf %6, %7 : vector<128x32xf32>
    %c0_6 = arith.constant 0 : index
    %c0_7 = arith.constant 0 : index
    %9 = vector.load %arg7[%c0_6, %c0_7] : memref<1x32xf32, #tpu.memory_space<vmem>>, vector<1x32xf32>
    %cst_8 = arith.constant dense<0.000000e+00> : vector<32xf32>
    %10 = vector.multi_reduction <add>, %8, %cst_8 [0] : vector<128x32xf32> to vector<32xf32>
    %11 = vector.shape_cast %10 : vector<32xf32> to vector<1x32xf32>
    %12 = arith.addf %9, %11 : vector<1x32xf32>
    %c0_9 = arith.constant 0 : index
    %c0_10 = arith.constant 0 : index
    %13 = vector.load %arg7[%c0_9, %c0_10] : memref<1x32xf32, #tpu.memory_space<vmem>>, vector<1x32xf32>
    tpu.vector_store %arg7[%c0_9, %c0_10], %12 {strides = array<i32>} : memref<1x32xf32, #tpu.memory_space<vmem>>, vector<1x32xf32>,
    %c1_i32 = arith.constant 1 : i32
    %14 = arith.cmpi eq, %arg1, %c1_i32 : i32
    %15 = arith.extui %14 : i1 to i32
    %c0_i32_11 = arith.constant 0 : i32
    %16 = arith.cmpi ne, %15, %c0_i32_11 : i32
    scf.if %16 {
      %c0_12 = arith.constant 0 : index
      %c0_13 = arith.constant 0 : index
      %17 = vector.load %arg7[%c0_12, %c0_13] : memref<1x32xf32, #tpu.memory_space<vmem>>, vector<1x32xf32>
      %c0_14 = arith.constant 0 : index
      %c0_15 = arith.constant 0 : index
      %18 = vector.load %arg4[%c0_14, %c0_15] : memref<32x1xf32, #tpu.memory_space<vmem>>, vector<32x1xf32>
      %cst_16 = arith.constant dense<0.000000e+00> : vector<1x1xf32>
      %19 = tpu.matmul %17, %18, %cst_16 {dimension_numbers = #tpu.dot_dimension_numbers<[1], [0], [0], [1], [0, 0, 1, 1], [], []>} : vector<1x32xf32>, vector<32x1xf32>, vector<1x1xf32> -> vector<1x1xf32>
      %c0_17 = arith.constant 0 : index
      %c0_18 = arith.constant 0 : index
      %20 = memref.load %arg5[%c0_17, %c0_18] : memref<1x1xf32, #tpu.memory_space<smem>>
      %21 = vector.broadcast %20 : f32 to vector<1x1xf32>
      %22 = arith.addf %19, %21 : vector<1x1xf32>
      %23 = arith.negf %22 : vector<1x1xf32>
      %24 = math.exp %23 : vector<1x1xf32>
      %cst_19 = arith.constant 1.000000e+00 : f32
      %25 = vector.broadcast %cst_19 : f32 to vector<1x1xf32>
      %26 = arith.addf %25, %24 : vector<1x1xf32>
      %27 = arith.divf %25, %26 : vector<1x1xf32>
      %c0_20 = arith.constant 0 : index
      %c0_21 = arith.constant 0 : index
      %c0_22 = arith.constant 0 : index
      %28 = vector.load %arg6[%c0_20, %c0_21, %c0_22] : memref<1x1x1xf32, #tpu.memory_space<vmem>>, vector<1x1x1xf32>
      %29 = vector.shape_cast %28 : vector<1x1x1xf32> to vector<1x1xf32>
      %30 = vector.shape_cast %27 : vector<1x1xf32> to vector<1x1x1xf32>
      tpu.vector_store %arg6[%c0_20, %c0_21, %c0_22], %30 {strides = array<i32>} : memref<1x1x1xf32, #tpu.memory_space<vmem>>, vector<1x1x1xf32>,
    } else {
    }
    return
  }
  func.func @transform_0(%arg0: i32, %arg1: i32) -> (i32, i32, i32) {
    %c0_i32 = arith.constant 0 : i32
    %c0_i32_0 = arith.constant 0 : i32
    return %arg0, %arg1, %c0_i32 : i32, i32, i32
  }
  func.func @transform_1(%arg0: i32, %arg1: i32) -> (i32, i32) {
    %c0_i32 = arith.constant 0 : i32
    %c0_i32_0 = arith.constant 0 : i32
    %c0_i32_1 = arith.constant 0 : i32
    return %c0_i32, %c0_i32_0 : i32, i32
  }
  func.func @transform_2(%arg0: i32, %arg1: i32) -> (i32, i32) {
    %c0_i32 = arith.constant 0 : i32
    %c0_i32_0 = arith.constant 0 : i32
    %c0_i32_1 = arith.constant 0 : i32
    return %c0_i32, %c0_i32_0 : i32, i32
  }
  func.func @transform_3(%arg0: i32, %arg1: i32) -> (i32, i32) {
    %c0_i32 = arith.constant 0 : i32
    %c0_i32_0 = arith.constant 0 : i32
    %c0_i32_1 = arith.constant 0 : i32
    return %c0_i32, %c0_i32_0 : i32, i32
  }
  func.func @transform_4(%arg0: i32, %arg1: i32) -> (i32, i32, i32) {
    %c0_i32 = arith.constant 0 : i32
    %c0_i32_0 = arith.constant 0 : i32
    %c0_i32_1 = arith.constant 0 : i32
    return %arg0, %c0_i32, %c0_i32_0 : i32, i32, i32
  }
}

</mosaic_0001>

<bundles_post_ra>
// kernel: ld_baseline_forward.1
= control target key start
LH: loop header
LB: loop body
LE: loop exit
PB: predicated region body
PF: predicated region fallthrough
CT: control target
= control target key end

     0   :  { %s695_s17 = smov 0   ;;  %s697_s18 = smov 0   ;;  %s835_s0 = inlined_call_operand.vmem [shape: f32[2,256,32], index: 0, kind: input, shape index: {}]   ;;  %s836_s1 = inlined_call_operand.vmem [shape: f32[32,32], index: 1, kind: input, shape index: {}]   ;;  %s837_s2 = inlined_call_operand.vmem [shape: f32[32,1], index: 2, kind: input, shape index: {}]   ;;  %s838_s3 = inlined_call_operand.<no memory space> [shape: f32[1,1], index: 3, kind: input, shape index: {}]   ;;  %s839_s4 = inlined_call_operand.vmem [shape: f32[2,1,1], index: 4, kind: output, shape index: {}]  }
   0x1   :  { %9 = sst [smem:[#allocation3]] %s838_s3  ;;  %s699_s19 = smov 0  }
   0x2   :  { %s701_s20 = smov 0   ;;  %s703_s21 = smov 0  }
   0x3 LB: > { %s24_s3 = sadd.s32 1, %s656_s19  ;;  %s27_s22 = sadd.s32 1, %s660_s20  ;;  %s664_s21 = sphi %s703_s21, %s15_s21   ;;  %s660_s20 = sphi %s701_s20, %s843_s20   ;;  %s656_s19 = sphi %s699_s19, %s842_s19   ;;  %s652_s18 = sphi %s697_s18, %s841_s18   ;;  %s648_s17 = sphi %s695_s17, %s840_s17  }
   0x4   : > { %p25_p0 = scmp.ge.s32.totalorder %s24_s3, 2  ;;  %p543_p1 = scmp.ge.s32.totalorder %s664_s21, 1 }
   0x5   : > { %p182_p2 = scmp.lt.s32.totalorder %s664_s21, 5 }
   0x6   : > { %s845_s3 = smov (%p25_p0, %s24_s3), 0  ;;  %s847_s22 = smov (!%p25_p0, %s27_s22), %s660_s20 }
   0x7   : > { %p183_p3 = pnand %p543_p1, %p182_p2  ;;  %p29_p4 = scmp.ge.s32.totalorder %s847_s22, 2 }
   0x8   : > { %s544_s23 = sshll.u32 (!%p183_p3), %s648_s17, 4  ;;  %p211_p5 = scmp.lt.s32.totalorder (!%p183_p3), %s652_s18, 1 }
   0x9   : > { %s849_s22 = smov (%p29_p4, %s847_s22), 0  ;;  %186 = sbr.rel (%p183_p3) target bundleno = 390 (0x186), region = 36 }
   0xa   : > { %p213_p6 = scmp.lt.s32.totalorder (!%p183_p3), %s544_s23, 31  ;;  %p547_p7 = scmp.ne.s32.totalorder (!%p183_p3), %s648_s17, 0 }
   0xe   : > { %s851_s18 = smov (!%p211_p5, %s652_s18), 1  ;;  %s853_s23 = smov (!%p213_p6, %s544_s23), 31 }
   0xf   : > { %s545_s24 = sshll.u32 %s851_s18, 5  ;;  %s222_s27 = scalar_lea.vmem %s839_s4, %s851_s18 }
  0x10   : > { %s216_s28 = sadd.s32 %s545_s24, %s853_s23  ;;  %226 = sbr.rel (%p547_p7) target bundleno = 23 (0x17), region = 40 }
  0x11   : > { %s546_s29 = sshll.u32 %s216_s28, 3 }
  0x12   : > { %s738_s6 = scalar_lea.vmem %s835_s0, %s546_s29 }
  0x15   : > { %vm227_vm0 = vcmask 253952   ;;  %v666_v0 = vmov 0.0  }
  0x16   : > { %228 = vst.msk [vmem:[#allocation2] sm:$0x1] %vm227_vm0, %v666_v0 }
  0x17 PF: > { %v248_v1 = vld [vmem:[%s836_s1 + $0x18] sm:$0xff]  ;;  %v247_v2 = vld [vmem:[%s836_s1 + $0x10] sm:$0xff]  ;;  %v246_v3 = vld [vmem:[%s836_s1 + $0x8] sm:$0xff]  ;;  %vm249_vm1 = vcmask 261120   ;;  %vm418_vm2 = vcmask 253952   ;;  %p564_p8 = scmp.ne.s32.totalorder %s648_s17, 1 }
  0x18   : > { %310 = vmatpush.msra.mxu0 %v248_v1  ;;  %569 = vmatpush.msra.mxu1 %v248_v1  ;;  %v245_v4 = vld [vmem:[%s836_s1] sm:$0xff]  ;;  %v230_v9 = vld [vmem:[%s738_s6 + $0x8] sm:$0xff]  ;;  %v231_v13 = vld [vmem:[%s738_s6 + $0x10] sm:$0xff]  ;;  %s429_s17 = sld [smem:[#allocation3]] (!%p564_p8) }
  0x19   : > { %570 = vmatpush.msra.mxu2 %v248_v1  ;;  %571 = vmatpush.msra.mxu3 %v248_v1  ;;  %v229_v5 = vld [vmem:[%s738_s6] sm:$0xff]  ;;  %v234_v10 = vld [vmem:[%s738_s6 + $0x28] sm:$0xff]  ;;  %v235_v14 = vld [vmem:[%s738_s6 + $0x30] sm:$0xff] }
  0x1a   : > { %311 = vmatpush.msra.mxu0 %v247_v2  ;;  %572 = vmatpush.msra.mxu1 %v247_v2  ;;  %v233_v6 = vld [vmem:[%s738_s6 + $0x20] sm:$0xff]  ;;  %v238_v11 = vld [vmem:[%s738_s6 + $0x48] sm:$0xff]  ;;  %v239_v15 = vld [vmem:[%s738_s6 + $0x50] sm:$0xff] }
  0x1b   : > { %573 = vmatpush.msra.mxu2 %v247_v2  ;;  %574 = vmatpush.msra.mxu3 %v247_v2  ;;  %v237_v7 = vld [vmem:[%s738_s6 + $0x40] sm:$0xff]  ;;  %v242_v12 = vld [vmem:[%s738_s6 + $0x68] sm:$0xff]  ;;  %v243_v16 = vld [vmem:[%s738_s6 + $0x70] sm:$0xff] }
  0x1c   : > { %312 = vmatpush.msra.mxu0 %v246_v3  ;;  %575 = vmatpush.msra.mxu1 %v246_v3  ;;  %v241_v8 = vld [vmem:[%s738_s6 + $0x60] sm:$0xff]  ;;  %v232_v17 = vld [vmem:[%s738_s6 + $0x18] sm:$0xff] }
  0x1d   : > { %576 = vmatpush.msra.mxu2 %v246_v3  ;;  %577 = vmatpush.msra.mxu3 %v246_v3  ;;  %v236_v18 = vld [vmem:[%s738_s6 + $0x38] sm:$0xff] }
  0x1e   : > { %313 = vmatpush.msra.mxu0 %v245_v4  ;;  %578 = vmatpush.msra.mxu1 %v245_v4  ;;  %v240_v19 = vld [vmem:[%s738_s6 + $0x58] sm:$0xff] }
  0x1f   : > { %548 = vmatmul.msk.f32.vlgmr.msra.gmra.mxu0 %vm249_vm1, %v229_v5  ;;  %552 = vmatmul.msk.f32.vlgmr.msra.gmra.mxu1 %vm249_vm1, %v233_v6  ;;  %v244_v20 = vld [vmem:[%s738_s6 + $0x78] sm:$0xff] }
  0x20   : > { %579 = vmatpush.msra.mxu2 %v245_v4  ;;  %580 = vmatpush.msra.mxu3 %v245_v4 }
  0x21   : > { %556 = vmatmul.msk.f32.vlgmr.msra.gmra.mxu2 %vm249_vm1, %v237_v7  ;;  %560 = vmatmul.msk.f32.vlgmr.msra.gmra.mxu3 %vm249_vm1, %v241_v8 }
  0x27   : > { %549 = vmatmul.msk.f32.gmra.mxu0 %vm249_vm1, %v230_v9  ;;  %553 = vmatmul.msk.f32.gmra.mxu1 %vm249_vm1, %v234_v10 }
  0x29   : > { %557 = vmatmul.msk.f32.gmra.mxu2 %vm249_vm1, %v238_v11  ;;  %561 = vmatmul.msk.f32.gmra.mxu3 %vm249_vm1, %v242_v12 }
  0x2f   : > { %550 = vmatmul.msk.f32.gmra.mxu0 %vm249_vm1, %v231_v13  ;;  %554 = vmatmul.msk.f32.gmra.mxu1 %vm249_vm1, %v235_v14 }
  0x31   : > { %558 = vmatmul.msk.f32.gmra.mxu2 %vm249_vm1, %v239_v15  ;;  %562 = vmatmul.msk.f32.gmra.mxu3 %vm249_vm1, %v243_v16 }
  0x37   : > { %551 = vmatmul.msk.f32.gmra.mxu0 %vm249_vm1, %v232_v17  ;;  %555 = vmatmul.msk.f32.gmra.mxu1 %vm249_vm1, %v236_v18 }
  0x39   : > { %559 = vmatmul.msk.f32.gmra.mxu2 %vm249_vm1, %v240_v19  ;;  %563 = vmatmul.msk.f32.gmra.mxu3 %vm249_vm1, %v244_v20 }
  0x9c   : > { %v315_v21 = vpop.f32.mrf.mxu0  ;;  %v327_v22 = vpop.f32.mrf.mxu1 }
  0x9d   : > { %v363_v31 = vmax.f32 %v315_v21, 0.0  ;;  %v367_v39 = vmax.f32 %v327_v22, 0.0 }
  0x9f   : > { %v380_v35 = vsel %vm249_vm1, %v363_v31, 0.0  ;;  %v387_v47 = vsel %vm249_vm1, %v367_v39, 0.0 }
  0xa4   : > { %v318_v23 = vpop.f32.mrf.mxu0  ;;  %v330_v24 = vpop.f32.mrf.mxu1 }
  0xa5   : > { %v339_v25 = vpop.f32.mrf.mxu2  ;;  %v351_v26 = vpop.f32.mrf.mxu3  ;;  %v364_v29 = vmax.f32 %v318_v23, 0.0  ;;  %v368_v44 = vmax.f32 %v330_v24, 0.0 }
  0xa6   : > { %v371_v54 = vmax.f32 %v339_v25, 0.0  ;;  %v375_v3 = vmax.f32 %v351_v26, 0.0  ;;  %v379_v25 = vld [vmem:[#allocation2] sm:$0x1] }
  0xa7   : > { %v381_v33 = vsel %vm249_vm1, %v364_v29, 0.0  ;;  %v389_v51 = vsel %vm249_vm1, %v368_v44, 0.0 }
  0xa8   : > { %v382_v37 = vadd.f32 %v381_v33, %v380_v35  ;;  %v395_v61 = vsel %vm249_vm1, %v371_v54, 0.0  ;;  %v403_v10 = vsel %vm249_vm1, %v375_v3, 0.0 }
  0xac   : > { %v321_v27 = vpop.f32.mrf.mxu0  ;;  %v333_v28 = vpop.f32.mrf.mxu1 }
  0xad   : > { %v342_v30 = vpop.f32.mrf.mxu2  ;;  %v365_v32 = vmax.f32 %v321_v27, 0.0  ;;  %v354_v34 = vpop.f32.mrf.mxu3  ;;  %v369_v48 = vmax.f32 %v333_v28, 0.0 }
  0xae   : > { %v372_v59 = vmax.f32 %v342_v30, 0.0  ;;  %v376_v8 = vmax.f32 %v354_v34, 0.0 }
  0xaf   : > { %v383_v36 = vsel %vm249_vm1, %v365_v32, 0.0  ;;  %v391_v55 = vsel %vm249_vm1, %v369_v48, 0.0 }
  0xb0   : > { %v384_v42 = vadd.f32 %v383_v36, %v382_v37  ;;  %v397_v1 = vsel %vm249_vm1, %v372_v59, 0.0  ;;  %v405_v14 = vsel %vm249_vm1, %v376_v8, 0.0 }
  0xb4   : > { %v324_v38 = vpop.f32.mrf.mxu0  ;;  %v336_v43 = vpop.f32.mrf.mxu1 }
  0xb5   : > { %v366_v40 = vmax.f32 %v324_v38, 0.0  ;;  %v345_v41 = vpop.f32.mrf.mxu2  ;;  %v370_v49 = vmax.f32 %v336_v43, 0.0  ;;  %v357_v53 = vpop.f32.mrf.mxu3 }
  0xb6   : > { %v373_v62 = vmax.f32 %v345_v41, 0.0  ;;  %v377_v11 = vmax.f32 %v357_v53, 0.0 }
  0xb7   : > { %v385_v45 = vsel %vm249_vm1, %v366_v40, 0.0  ;;  %v393_v56 = vsel %vm249_vm1, %v370_v49, 0.0 }
  0xb8   : > { %v386_v46 = vadd.f32 %v385_v45, %v384_v42  ;;  %v399_v4 = vsel %vm249_vm1, %v373_v62, 0.0  ;;  %v407_v16 = vsel %vm249_vm1, %v377_v11, 0.0 }
  0xba   : > { %v388_v50 = vadd.f32 %v387_v47, %v386_v46 }
  0xbc   : > { %v390_v52 = vadd.f32 %v389_v51, %v388_v50 }
  0xbd   : > { %v348_v58 = vpop.f32.mrf.mxu2  ;;  %v360_v7 = vpop.f32.mrf.mxu3 }
  0xbe   : > { %v392_v57 = vadd.f32 %v391_v55, %v390_v52  ;;  %v374_v63 = vmax.f32 %v348_v58, 0.0  ;;  %v378_v12 = vmax.f32 %v360_v7, 0.0 }
  0xc0   : > { %v394_v60 = vadd.f32 %v393_v56, %v392_v57  ;;  %v401_v5 = vsel %vm249_vm1, %v374_v63, 0.0  ;;  %v409_v17 = vsel %vm249_vm1, %v378_v12, 0.0 }
  0xc2   : > { %v396_v0 = vadd.f32 %v395_v61, %v394_v60 }
  0xc4   : > { %v398_v2 = vadd.f32 %v397_v1, %v396_v0 }
  0xc6   : > { %v400_v6 = vadd.f32 %v399_v4, %v398_v2 }
  0xc8   : > { %v402_v9 = vadd.f32 %v401_v5, %v400_v6 }
  0xca   : > { %v404_v13 = vadd.f32 %v403_v10, %v402_v9 }
  0xcc   : > { %v406_v15 = vadd.f32 %v405_v14, %v404_v13 }
  0xce   : > { %v408_v18 = vadd.f32 %v407_v16, %v406_v15 }
  0xd0   : > { %v410_v19 = vadd.f32 %v409_v17, %v408_v18 }
  0xd2   : > { %v411_v20 = vrot.slane %v410_v19, 4 }
  0xd4   : > { %v412_v21 = vadd.f32 %v411_v20, %v410_v19 }
  0xd6   : > { %v413_v22 = vrot.slane %v412_v21, 2 }
  0xd8   : > { %v414_v23 = vadd.f32 %v413_v22, %v412_v21 }
  0xda   : > { %v415_v24 = vrot.slane %v414_v23, 1 }
  0xdc   : > { %v416_v26 = vadd.f32 %v415_v24, %v414_v23  ;;  %423 = sbr.rel (%p564_p8) target bundleno = 390 (0x186), region = 44 }
  0xde   : > { %v417_v27 = vadd.f32 %v416_v26, %v379_v25 }
  0xe0   : > { %419 = vst.msk [vmem:[#allocation2] sm:$0x1] %vm418_vm2, %v417_v27 }
  0xe1   : > { %v428_v28 = vld [vmem:[%s837_s2 + $0x18] sm:$0xff]  ;;  %v427_v29 = vld [vmem:[%s837_s2 + $0x10] sm:$0xff]  ;;  %v426_v30 = vld [vmem:[%s837_s2 + $0x8] sm:$0xff]  ;;  %v430_v33 = vstv %s429_s17  ;;  %vm473_vm6 = vcmask 0  }
  0xe2   : > { %446 = vmatpush.msra.mxu0 %v428_v28  ;;  %v425_v31 = vld [vmem:[%s837_s2] sm:$0xff] }
  0xe4   : > { %447 = vmatpush.msra.mxu0 %v427_v29 }
  0xe6   : > { %448 = vmatpush.msra.mxu0 %v426_v30 }
  0xe7   : > { %v424_v32 = vld [vmem:[#allocation2] sm:$0x1] }
  0xe8   : > { %449 = vmatpush.msra.mxu0 %v425_v31 }
  0xe9   : > { %565 = vmatmul.msk.f32.vlgmr.msra.gmra.mxu0 %vm249_vm1, %v424_v32 }
 0x166   : > { %v451_v34 = vpop.f32.mrf.mxu0 }
 0x167   : > { %v452_v35 = vadd.f32 %v451_v34, %v430_v33 }
 0x169   : > { %v566_v36 = vmul.f32 -1.442695, %v452_v35 }
 0x16b   : > { %622 = vpow2.f32 %v566_v36 }
 0x171   : > { %v623_v37 = vpop.eup %622 }
 0x172   : > { %v457_v38 = vadd.f32 1.0, %v623_v37 }
 0x174   : > { %624 = vrcp.f32 %v457_v38  ;;  %v469_v42 = vand.u32 2147483648, %v457_v38  ;;  %v467_v44 = vand.u32 2147483647, %v457_v38  ;;  %vm463_vm4 = vweird.f32 %v457_v38 }
 0x176   : > { %v470_v46 = vor.u32 1.1754944e-38, %v469_v42  ;;  %vm468_vm7 = vcmp.eq.f32.partialorder %v467_v44, 8.507059e+37 }
 0x17a   : > { %v625_v39 = vpop.eup %624 }
 0x17b   : > { %v459_v40 = vmul.f32 %v625_v39, %v457_v38  ;;  %vm464_vm3 = vweird.f32 %v625_v39 }
 0x17c   : > { %vm465_vm5 = vmor %vm463_vm4, %vm464_vm3 }
 0x17d   : > { %v460_v41 = vsub.f32 1.0, %v459_v40 }
 0x17f   : > { %v461_v43 = vmul.f32 %v625_v39, %v460_v41 }
 0x181   : > { %v462_v45 = vadd.f32 %v625_v39, %v461_v43 }
 0x183   : > { %v466_v47 = vsel %vm465_vm5, %v625_v39, %v462_v45 }
 0x184   : > { %v471_v48 = vsel %vm468_vm7, %v470_v46, %v466_v47 }
 0x185   : > { %474 = vst.msk [vmem:[%s222_s27] sm:$0x1] %vm473_vm6, %v471_v48 }
 0x186 PF: > { %s15_s21 = sadd.s32 1, %s664_s21   ;;  %s840_s17 = smov %s656_s19 }
 0x187   : > { %p12_p9 = scmp.ge.s32.totalorder %s15_s21, 6   ;;  %s841_s18 = smov %s660_s20 }
 0x188   : > { %s842_s19 = smov %s845_s3  ;;  %s843_s20 = smov %s849_s22 }
 0x189   :  { %14 = sbr.rel (!%p12_p9) target bundleno = 3 (0x3), region = 74 }

</bundles_post_ra>
